<compile_context>
chip_gen: v6e
topology: v6e:2x2x1
jax: 0.10.0
libtpu: 0.0.40
codegen_flags: <defaults>
</compile_context>

<pallas_src>
import jax
import jax.numpy as jnp
from jax.experimental import pallas as pl
from jax.experimental.pallas import tpu as pltpu


_MIB = 1024 * 1024
_LN_EPS = 1e-8  # matches nn.LayerNorm(..., eps=1e-08) in the torch module


def _round_up(a, b):
    return (a + b - 1) // b * b


def _vmem_capacity_bytes():
    """Per-core VMEM capacity; conservative fallback if the query fails."""
    try:
        cap = int(getattr(pltpu.get_tpu_info(), "vmem_capacity_bytes", 0))
        if cap > 0:
            return cap
    except Exception:
        pass
    return 64 * _MIB   # v7x per-TensorCore size = safe lower bound


def _vmem_limit(est, capacity):
    # leave ~12 MiB for Mosaic internal scratch / DMA descriptors
    limit = min(capacity - 12 * _MIB, max(32 * _MIB, est + 12 * _MIB))
    return int(max(limit, 16 * _MIB))


def _layernorm(x, gamma, beta, eps):
    # One-pass statistics (E[x^2] - mu^2): one fewer full subtract/square sweep
    # on the VPU and one fewer XLU reduce than the textbook two-pass form.
    mu = jnp.mean(x, axis=-1, keepdims=True)
    ms = jnp.mean(x * x, axis=-1, keepdims=True)
    var = jnp.maximum(ms - mu * mu, 0.0)
    return (x - mu) * jax.lax.rsqrt(var + eps) * gamma + beta


def _gelu_exact(x):
    # torch.nn.GELU() default: exact erf formulation
    return 0.5 * x * (1.0 + jax.lax.erf(x * jnp.float32(0.7071067811865476)))


# ----------------------------------------------------------------------------
# Resident-weights kernel: full W1/W2 live in VMEM, grid over row tiles only.
# ----------------------------------------------------------------------------
def _ffn_kernel_resident(x_ref, w1_ref, b1_ref, g1_ref, bb1_ref,
                         w2_ref, b2_ref, g2_ref, bb2_ref, o_ref):
    x_raw = x_ref[...]                       # single VMEM load, reused
    x_f32 = x_raw.astype(jnp.float32)        # residual path stays f32
    x_mxu = x_raw.astype(w1_ref.dtype)
    eps = jnp.float32(_LN_EPS)

    # linear1: [TN, D] @ [D, 2D] + [1, 2D]  (MXU operands in weight dtype,
    # f32 accumulation); dropout1 = identity (eval mode)
    h = jnp.dot(x_mxu, w1_ref[...], preferred_element_type=jnp.float32) + b1_ref[...]
    h = _gelu_exact(_layernorm(h, g1_ref[...], bb1_ref[...], eps))

    # linear2: [TN, 2D] @ [2D, D] + [1, D]; dropout2 = identity (eval mode)
    h2 = jnp.dot(h.astype(w2_ref.dtype), w2_ref[...],
                 preferred_element_type=jnp.float32) + b2_ref[...]
    y = _gelu_exact(_layernorm(h2 + x_f32, g2_ref[...], bb2_ref[...], eps))

    o_ref[...] = y.astype(o_ref.dtype)


def _vmem_estimate_resident(row_tile, D, H, wbytes):
    weights = 2 * D * H * wbytes              # w1 + w2, single-buffered
    vec = 2 * (3 * H + 3 * D) * 4             # biases / gamma / beta (headroom 2x)
    io = 2 * (2 * row_tile * D * 4)           # x + out tiles, double-buffered
    live = 3 * row_tile * H * 4               # [TN, 2D] f32 intermediates + slack
    return weights + vec + io + live


def _ffn_resident(x2d, w1, b1, g1, bb1, w2, b2, g2, bb2, *,
                  N, D, H, budget, capacity, row_tile, wbytes, out_dtype):
    if row_tile is None:
        # Biggest MXU-friendly tile that fits ~75% of per-core VMEM.
        row_tile = min(1024, _round_up(N, 8))
        min_rows = min(256, _round_up(N, 8))   # never below MXU fill height
        while (row_tile > min_rows
               and _vmem_estimate_resident(row_tile, D, H, wbytes) > budget):
            row_tile = max(min_rows, row_tile // 2)
        # Keep >= 2 grid steps so both v7x TensorCores get work.
        if N > 8 and _round_up(N, row_tile) <= row_tile:
            row_tile = _round_up((N + 1) // 2, 8)
    row_tile = max(8, _round_up(int(row_tile), 8))

    N_pad = _round_up(N, row_tile)
    if N_pad != N:
        x2d = jnp.pad(x2d, ((0, N_pad - N), (0, 0)))

    est = _vmem_estimate_resident(row_tile, D, H, wbytes)
    vmem_limit = _vmem_limit(est, capacity)

    # grid-invariant operands: constant index_map -> single-buffer them
    def _const_spec(shape):
        return pl.BlockSpec(shape, lambda i: (0, 0), pipeline_mode=pl.Buffered(1))

    cost = pl.CostEstimate(
        flops=int(4 * N_pad * D * H),
        transcendentals=int(N_pad * (H + D + 2)),
        bytes_accessed=int(2 * D * H * wbytes + 2 * N_pad * D * 4
                           + (3 * H + 3 * D) * 4),
    )

    return pl.pallas_call(
        _ffn_kernel_resident,
        out_shape=jax.ShapeDtypeStruct((N_pad, D), out_dtype),
        grid_spec=pltpu.PrefetchScalarGridSpec(
            num_scalar_prefetch=0,
            grid=(N_pad // row_tile,),
            in_specs=[
                pl.BlockSpec((row_tile, D), lambda i: (i, 0)),   # x tile
                _const_spec((D, H)),                             # w1
                _const_spec((1, H)),                             # b1
                _const_spec((1, H)),                             # gamma1
                _const_spec((1, H)),                             # beta1
                _const_spec((H, D)),                             # w2
                _const_spec((1, D)),                             # b2
                _const_spec((1, D)),                             # gamma2
                _const_spec((1, D)),                             # beta2
            ],
            out_specs=pl.BlockSpec((row_tile, D), lambda i: (i, 0)),
        ),
        compiler_params=pltpu.CompilerParams(
            dimension_semantics=("parallel",),
            vmem_limit_bytes=vmem_limit,
        ),
        cost_estimate=cost,
    )(x2d, w1, b1, g1, bb1, w2, b2, g2, bb2)


# ----------------------------------------------------------------------------
# Hidden-dim-tiled kernel: weights streamed in [*, h_tile] chunks via a
# reduction grid axis of length 2*nh (phase 1: matmul1 + LN1 stats; phase 2:
# normalize/GELU chunk + matmul2 accumulation).  Used when full weights do not
# fit the VMEM budget (e.g. D >= ~2048 bf16 on v7x).
# ----------------------------------------------------------------------------
def _ffn_kernel_htiled(x_ref, w1_ref, b1_ref, g1_ref, bb1_ref,
                       w2_ref, b2_ref, g2_ref, bb2_ref, o_ref,
                       h_scr, sum_scr, sq_scr, acc_scr):
    k = pl.program_id(1)
    nh = h_scr.shape[0]                      # number of hidden-dim chunks (static)
    h_tile = h_scr.shape[2]
    H = nh * h_tile
    eps = jnp.float32(_LN_EPS)

    @pl.when(k == 0)
    def _init():
        sum_scr[...] = jnp.zeros_like(sum_scr)
        sq_scr[...] = jnp.zeros_like(sq_scr)
        acc_scr[...] = jnp.zeros_like(acc_scr)

    # Phase 1 (k in [0, nh)): hidden chunk = x @ W1[:, chunk] + b1[chunk];
    # stash it in VMEM scratch and accumulate LayerNorm-1 statistics.
    @pl.when(k < nh)
    def _phase1():
        h = jnp.dot(x_ref[...].astype(w1_ref.dtype), w1_ref[...],
                    preferred_element_type=jnp.float32) + b1_ref[...]
        h_scr[jnp.minimum(k, nh - 1)] = h
        sum_scr[...] += jnp.sum(h, axis=-1, keepdims=True)
        sq_scr[...] += jnp.sum(h * h, axis=-1, keepdims=True)

    # Phase 2 (k in [nh, 2*nh)): normalize chunk, GELU, matmul-2 partial sum.
    @pl.when(k >= nh)
    def _phase2():
        j = jnp.maximum(k - nh, 0)
        mu = sum_scr[...] * jnp.float32(1.0 / H)
        var = jnp.maximum(sq_scr[...] * jnp.float32(1.0 / H) - mu * mu, 0.0)
        inv = jax.lax.rsqrt(var + eps)
        hn = (h_scr[j] - mu) * inv * g1_ref[...] + bb1_ref[...]
        hn = _gelu_exact(hn)
        acc_scr[...] += jnp.dot(hn.astype(w2_ref.dtype), w2_ref[...],
                                preferred_element_type=jnp.float32)

    # Finalize: bias2 + residual, LayerNorm-2, GELU, write the output tile.
    @pl.when(k == 2 * nh - 1)
    def _finalize():
        pre = acc_scr[...] + b2_ref[...] + x_ref[...].astype(jnp.float32)
        y = _gelu_exact(_layernorm(pre, g2_ref[...], bb2_ref[...], eps))
        o_ref[...] = y.astype(o_ref.dtype)


def _vmem_estimate_htiled(row_tile, h_tile, D, H, wbytes):
    w_chunks = 4 * D * h_tile * wbytes            # w1 + w2 chunk, double-buffered
    vec = 2 * (3 * h_tile + 3 * D) * 4
    io = 4 * row_tile * D * 4                     # x + out tiles, double-buffered
    scratch = row_tile * (H + D + 256) * 4        # h_scr + acc + stats
    live = 4 * row_tile * h_tile * 4              # in-flight intermediates
    return w_chunks + vec + io + scratch + live


def _ffn_h_tiled(x2d, w1, b1, g1, bb1, w2, b2, g2, bb2, *,
                 N, D, H, budget, capacity, row_tile, h_tile, wbytes, out_dtype):
    if row_tile is None:
        row_tile = min(256, _round_up(N, 8))
    row_tile = max(8, _round_up(int(row_tile), 8))

    if h_tile is None:
        h_tile = 128
        while (h_tile * 2 <= H and H % (h_tile * 2) == 0
               and _vmem_estimate_htiled(row_tile, h_tile * 2, D, H, wbytes) <= budget):
            h_tile *= 2
    assert H % h_tile == 0 and h_tile % 128 == 0, "h_tile must divide H, %128==0"

    while row_tile > 8 and _vmem_estimate_htiled(row_tile, h_tile, D, H, wbytes) > budget:
        row_tile = max(8, row_tile // 2)

    nh = H // h_tile
    N_pad = _round_up(N, row_tile)
    if N_pad != N:
        x2d = jnp.pad(x2d, ((0, N_pad - N), (0, 0)))

    est = _vmem_estimate_htiled(row_tile, h_tile, D, H, wbytes)
    vmem_limit = _vmem_limit(est, capacity)

    # Index maps: clamp so each weight chunk is only DMA'd in the phase that
    # needs it (min/max keep the block index constant during the other phase).
    def x_map(i, k): return (i, 0)
    def w1_map(i, k): return (0, jnp.minimum(k, nh - 1))
    def b1_map(i, k): return (0, jnp.minimum(k, nh - 1))
    def g1_map(i, k): return (0, jnp.maximum(k - nh, 0))
    def w2_map(i, k): return (jnp.maximum(k - nh, 0), 0)
    def vec_d_map(i, k): return (0, 0)

    cost = pl.CostEstimate(
        flops=int(4 * N_pad * D * H),
        transcendentals=int(N_pad * (H + D + 2)),
        bytes_accessed=int((N_pad // row_tile) * 2 * D * H * wbytes
                           + 2 * N_pad * D * 4 + (3 * H + 3 * D) * 4),
    )

    return pl.pallas_call(
        _ffn_kernel_htiled,
        out_shape=jax.ShapeDtypeStruct((N_pad, D), out_dtype),
        grid_spec=pltpu.PrefetchScalarGridSpec(
            num_scalar_prefetch=0,
            grid=(N_pad // row_tile, 2 * nh),
            in_specs=[
                pl.BlockSpec((row_tile, D), x_map),                       # x tile
                pl.BlockSpec((D, h_tile), w1_map),                        # w1 chunk
                pl.BlockSpec((1, h_tile), b1_map),                        # b1 chunk
                pl.BlockSpec((1, h_tile), g1_map),                        # gamma1 chunk
                pl.BlockSpec((1, h_tile), g1_map),                        # beta1 chunk
                pl.BlockSpec((h_tile, D), w2_map),                        # w2 chunk
                pl.BlockSpec((1, D), vec_d_map, pipeline_mode=pl.Buffered(1)),  # b2
                pl.BlockSpec((1, D), vec_d_map, pipeline_mode=pl.Buffered(1)),  # gamma2
                pl.BlockSpec((1, D), vec_d_map, pipeline_mode=pl.Buffered(1)),  # beta2
            ],
            out_specs=pl.BlockSpec((row_tile, D), x_map),
            scratch_shapes=[
                pltpu.VMEM((nh, row_tile, h_tile), jnp.float32),   # stored hidden
                pltpu.VMEM((row_tile, 1), jnp.float32),            # sum(h)
                pltpu.VMEM((row_tile, 1), jnp.float32),            # sum(h^2)
                pltpu.VMEM((row_tile, D), jnp.float32),            # matmul2 acc
            ],
        ),
        compiler_params=pltpu.CompilerParams(
            dimension_semantics=("parallel", "arbitrary"),
            vmem_limit_bytes=vmem_limit,
        ),
        cost_estimate=cost,
    )(x2d, w1, b1, g1, bb1, w2, b2, g2, bb2)


# ----------------------------------------------------------------------------
# Public wrapper
# ----------------------------------------------------------------------------
def feed_forward_pallas(x, params, *, row_tile=None, h_tile=None,
                        mxu_dtype=jnp.bfloat16, force_h_tiled=False):
    """x: [B, S, D] float32. Returns [B, S, D] in x.dtype (eval-mode FFN)."""
    B, S, D = x.shape
    H = 2 * D
    N = B * S
    wbytes = jnp.dtype(mxu_dtype).itemsize

    capacity = _vmem_capacity_bytes()
    budget = int(capacity * 3 // 4)          # ~75% of per-core VMEM

    x2d = x.reshape(N, D)
    w1 = params["w1"].astype(mxu_dtype)                 # [D, H]
    w2 = params["w2"].astype(mxu_dtype)                 # [H, D]
    b1 = params["b1"].reshape(1, H).astype(jnp.float32)
    g1 = params["g1"].reshape(1, H).astype(jnp.float32)
    bb1 = params["bb1"].reshape(1, H).astype(jnp.float32)
    b2 = params["b2"].reshape(1, D).astype(jnp.float32)
    g2 = params["g2"].reshape(1, D).astype(jnp.float32)
    bb2 = params["bb2"].reshape(1, D).astype(jnp.float32)

    min_rows = min(256, _round_up(N, 8))
    resident_fits = _vmem_estimate_resident(min_rows, D, H, wbytes) <= budget
    use_h_tiled = (force_h_tiled or not resident_fits) and (H % 128 == 0)

    if use_h_tiled:
        out2d = _ffn_h_tiled(x2d, w1, b1, g1, bb1, w2, b2, g2, bb2,
                             N=N, D=D, H=H, budget=budget, capacity=capacity,
                             row_tile=row_tile, h_tile=h_tile, wbytes=wbytes,
                             out_dtype=x.dtype)
    else:
        out2d = _ffn_resident(x2d, w1, b1, g1, bb1, w2, b2, g2, bb2,
                              N=N, D=D, H=H, budget=budget, capacity=capacity,
                              row_tile=row_tile, wbytes=wbytes, out_dtype=x.dtype)

    return out2d[:N].reshape(B, S, D)


def init_params(key, embed_dim):
    """Deterministic parameter init matching nn.Linear/nn.LayerNorm shapes."""
    D = embed_dim
    H = 2 * D
    k1, k2, k3, k4 = jax.random.split(key, 4)
    bound1 = 1.0 / (D ** 0.5)
    bound2 = 1.0 / (H ** 0.5)
    return {
        "w1": jax.random.uniform(k1, (D, H), jnp.float32, -bound1, bound1),
        "b1": jax.random.uniform(k2, (H,), jnp.float32, -bound1, bound1),
        "g1": jnp.ones((H,), jnp.float32),
        "bb1": jnp.zeros((H,), jnp.float32),
        "w2": jax.random.uniform(k3, (H, D), jnp.float32, -bound2, bound2),
        "b2": jax.random.uniform(k4, (D,), jnp.float32, -bound2, bound2),
        "g2": jnp.ones((D,), jnp.float32),
        "bb2": jnp.zeros((D,), jnp.float32),
    }


def _ref_layernorm(x, g, b, eps):
    mu = jnp.mean(x, axis=-1, keepdims=True)
    var = jnp.mean(jnp.square(x - mu), axis=-1, keepdims=True)
    return (x - mu) / jnp.sqrt(var + eps) * g + b


def feed_forward_ref(x, params):
    """Pure-JAX f32 reference (eval mode, dropout = identity)."""
    h = x @ params["w1"] + params["b1"]
    h = _ref_layernorm(h, params["g1"], params["bb1"], _LN_EPS)
    h = _gelu_exact(h)
    h2 = h @ params["w2"] + params["b2"]
    y = _ref_layernorm(h2 + x, params["g2"], params["bb2"], _LN_EPS)
    return _gelu_exact(y)


if __name__ == "__main__":
    key = jax.random.PRNGKey(0)
    kx, kp, k3, k4, k5, k6 = jax.random.split(key, 6)

    # --- Test 1: resident path, f32 MXU operands (exact) --------------------
    B, S, D = 2, 8, 128
    x = jax.random.normal(kx, (B, S, D), jnp.float32)
    params = init_params(kp, D)
    ref = feed_forward_ref(x, params)
    out_f32 = jax.block_until_ready(
        feed_forward_pallas(x, params, mxu_dtype=jnp.float32))
    assert out_f32.shape == (B, S, D)
    assert jnp.allclose(out_f32, ref, atol=2e-4, rtol=2e-4), "resident f32 mismatch"

    # --- Test 2: resident path, default bf16 MXU operands -------------------
    out_bf16 = jax.block_until_ready(feed_forward_pallas(x, params))
    assert out_bf16.shape == (B, S, D)
    assert jnp.allclose(out_bf16, ref, atol=5e-2, rtol=5e-2), "resident bf16 mismatch"

    # --- Test 3: ragged row count, small D (not a multiple of 128) ----------
    B2, S2, D2 = 2, 7, 32
    x2 = jax.random.normal(k3, (B2, S2, D2), jnp.float32)
    params2 = init_params(k4, D2)
    out2 = jax.block_until_ready(
        feed_forward_pallas(x2, params2, mxu_dtype=jnp.float32))
    ref2 = feed_forward_ref(x2, params2)
    assert out2.shape == (B2, S2, D2)
    assert jnp.allclose(out2, ref2, atol=2e-4, rtol=2e-4), "ragged-N mismatch"

    # --- Test 4: forced hidden-dim-tiled path (multi-chunk, ragged rows) ----
    B3, S3, D3 = 2, 9, 256
    x3 = jax.random.normal(k5, (B3, S3, D3), jnp.float32)
    params3 = init_params(k6, D3)
    out3 = jax.block_until_ready(
        feed_forward_pallas(x3, params3, mxu_dtype=jnp.float32,
                            force_h_tiled=True, h_tile=128))
    ref3 = feed_forward_ref(x3, params3)
    assert out3.shape == (B3, S3, D3)
    assert jnp.allclose(out3, ref3, atol=2e-4, rtol=2e-4), "H-tiled mismatch"

    print("KERNEL_OK")
</pallas_src>

<mosaic_0001>
module attributes {stable_mosaic.version = 11 : i64} {
  func.func @_ffn_kernel_resident(%arg0: i32, %arg1: memref<8x128xf32, #tpu.memory_space<vmem>>, %arg2: memref<128x256xf32, #tpu.memory_space<vmem>>, %arg3: memref<1x256xf32, #tpu.memory_space<vmem>>, %arg4: memref<1x256xf32, #tpu.memory_space<vmem>>, %arg5: memref<1x256xf32, #tpu.memory_space<vmem>>, %arg6: memref<256x128xf32, #tpu.memory_space<vmem>>, %arg7: memref<1x128xf32, #tpu.memory_space<vmem>>, %arg8: memref<1x128xf32, #tpu.memory_space<vmem>>, %arg9: memref<1x128xf32, #tpu.memory_space<vmem>>, %arg10: memref<8x128xf32, #tpu.memory_space<vmem>>) attributes {dimension_semantics = [#tpu.dimension_semantics<parallel>], iteration_bounds = array<i64: 2>, scalar_prefetch = 0 : i64, scratch_operands = 0 : i64, tpu.core_type = #tpu.core_type<tc>, window_params = [{transform_indices = @transform_0, window_bounds = array<i64: 8, 128>}, {pipeline_mode = #tpu.pipeline_mode<synchronous>, transform_indices = @transform_1, window_bounds = array<i64: 128, 256>}, {pipeline_mode = #tpu.pipeline_mode<synchronous>, transform_indices = @transform_2, window_bounds = array<i64: 1, 256>}, {pipeline_mode = #tpu.pipeline_mode<synchronous>, transform_indices = @transform_3, window_bounds = array<i64: 1, 256>}, {pipeline_mode = #tpu.pipeline_mode<synchronous>, transform_indices = @transform_4, window_bounds = array<i64: 1, 256>}, {pipeline_mode = #tpu.pipeline_mode<synchronous>, transform_indices = @transform_5, window_bounds = array<i64: 256, 128>}, {pipeline_mode = #tpu.pipeline_mode<synchronous>, transform_indices = @transform_6, window_bounds = array<i64: 1, 128>}, {pipeline_mode = #tpu.pipeline_mode<synchronous>, transform_indices = @transform_7, window_bounds = array<i64: 1, 128>}, {pipeline_mode = #tpu.pipeline_mode<synchronous>, transform_indices = @transform_8, window_bounds = array<i64: 1, 128>}, {transform_indices = @transform_9, window_bounds = array<i64: 8, 128>}]} {
    %c0 = arith.constant 0 : index
    %c0_0 = arith.constant 0 : index
    %0 = vector.load %arg1[%c0, %c0_0] : memref<8x128xf32, #tpu.memory_space<vmem>>, vector<8x128xf32>
    %c0_1 = arith.constant 0 : index
    %c0_2 = arith.constant 0 : index
    %1 = vector.load %arg2[%c0_1, %c0_2] : memref<128x256xf32, #tpu.memory_space<vmem>>, vector<128x256xf32>
    %cst = arith.constant dense<0.000000e+00> : vector<8x256xf32>
    %2 = tpu.matmul %0, %1, %cst {dimension_numbers = #tpu.dot_dimension_numbers<[1], [0], [0], [1], [0, 0, 1, 1], [], []>} : vector<8x128xf32>, vector<128x256xf32>, vector<8x256xf32> -> vector<8x256xf32>
    %c0_3 = arith.constant 0 : index
    %c0_4 = arith.constant 0 : index
    %3 = vector.load %arg3[%c0_3, %c0_4] : memref<1x256xf32, #tpu.memory_space<vmem>>, vector<1x256xf32>
    %4 = vector.broadcast %3 : vector<1x256xf32> to vector<8x256xf32>
    %5 = arith.addf %2, %4 : vector<8x256xf32>
    %c0_5 = arith.constant 0 : index
    %c0_6 = arith.constant 0 : index
    %6 = vector.load %arg4[%c0_5, %c0_6] : memref<1x256xf32, #tpu.memory_space<vmem>>, vector<1x256xf32>
    %c0_7 = arith.constant 0 : index
    %c0_8 = arith.constant 0 : index
    %7 = vector.load %arg5[%c0_7, %c0_8] : memref<1x256xf32, #tpu.memory_space<vmem>>, vector<1x256xf32>
    %cst_9 = arith.constant dense<0.000000e+00> : vector<8xf32>
    %8 = vector.multi_reduction <add>, %5, %cst_9 [1] : vector<8x256xf32> to vector<8xf32>
    %9 = vector.shape_cast %8 : vector<8xf32> to vector<8x1xf32>
    %cst_10 = arith.constant 2.560000e+02 : f32
    %10 = vector.broadcast %cst_10 : f32 to vector<8x1xf32>
    %11 = arith.divf %9, %10 : vector<8x1xf32>
    %12 = arith.mulf %5, %5 : vector<8x256xf32>
    %cst_11 = arith.constant dense<0.000000e+00> : vector<8xf32>
    %13 = vector.multi_reduction <add>, %12, %cst_11 [1] : vector<8x256xf32> to vector<8xf32>
    %14 = vector.shape_cast %13 : vector<8xf32> to vector<8x1xf32>
    %cst_12 = arith.constant 2.560000e+02 : f32
    %15 = vector.broadcast %cst_12 : f32 to vector<8x1xf32>
    %16 = arith.divf %14, %15 : vector<8x1xf32>
    %17 = arith.mulf %11, %11 : vector<8x1xf32>
    %18 = arith.subf %16, %17 : vector<8x1xf32>
    %cst_13 = arith.constant 0.000000e+00 : f32
    %19 = vector.broadcast %cst_13 : f32 to vector<8x1xf32>
    %20 = arith.maximumf %18, %19 : vector<8x1xf32>
    %21 = vector.broadcast %11 : vector<8x1xf32> to vector<8x256xf32>
    %22 = arith.subf %5, %21 : vector<8x256xf32>
    %cst_14 = arith.constant 9.99999993E-9 : f32
    %23 = vector.broadcast %cst_14 : f32 to vector<8x1xf32>
    %24 = arith.addf %20, %23 : vector<8x1xf32>
    %25 = math.rsqrt %24 : vector<8x1xf32>
    %26 = vector.broadcast %25 : vector<8x1xf32> to vector<8x256xf32>
    %27 = arith.mulf %22, %26 : vector<8x256xf32>
    %28 = vector.broadcast %6 : vector<1x256xf32> to vector<8x256xf32>
    %29 = arith.mulf %27, %28 : vector<8x256xf32>
    %30 = vector.broadcast %7 : vector<1x256xf32> to vector<8x256xf32>
    %31 = arith.addf %29, %30 : vector<8x256xf32>
    %cst_15 = arith.constant 5.000000e-01 : f32
    %32 = vector.broadcast %cst_15 : f32 to vector<8x256xf32>
    %33 = arith.mulf %32, %31 : vector<8x256xf32>
    %cst_16 = arith.constant 0.707106769 : f32
    %34 = vector.broadcast %cst_16 : f32 to vector<8x256xf32>
    %35 = arith.mulf %31, %34 : vector<8x256xf32>
    %36 = math.erf %35 : vector<8x256xf32>
    %cst_17 = arith.constant 1.000000e+00 : f32
    %37 = vector.broadcast %cst_17 : f32 to vector<8x256xf32>
    %38 = arith.addf %37, %36 : vector<8x256xf32>
    %39 = arith.mulf %33, %38 : vector<8x256xf32>
    %c0_18 = arith.constant 0 : index
    %c0_19 = arith.constant 0 : index
    %40 = vector.load %arg6[%c0_18, %c0_19] : memref<256x128xf32, #tpu.memory_space<vmem>>, vector<256x128xf32>
    %cst_20 = arith.constant dense<0.000000e+00> : vector<8x128xf32>
    %41 = tpu.matmul %39, %40, %cst_20 {dimension_numbers = #tpu.dot_dimension_numbers<[1], [0], [0], [1], [0, 0, 1, 1], [], []>} : vector<8x256xf32>, vector<256x128xf32>, vector<8x128xf32> -> vector<8x128xf32>
    %c0_21 = arith.constant 0 : index
    %c0_22 = arith.constant 0 : index
    %42 = vector.load %arg7[%c0_21, %c0_22] : memref<1x128xf32, #tpu.memory_space<vmem>>, vector<1x128xf32>
    %43 = vector.broadcast %42 : vector<1x128xf32> to vector<8x128xf32>
    %44 = arith.addf %41, %43 : vector<8x128xf32>
    %45 = arith.addf %44, %0 : vector<8x128xf32>
    %c0_23 = arith.constant 0 : index
    %c0_24 = arith.constant 0 : index
    %46 = vector.load %arg8[%c0_23, %c0_24] : memref<1x128xf32, #tpu.memory_space<vmem>>, vector<1x128xf32>
    %c0_25 = arith.constant 0 : index
    %c0_26 = arith.constant 0 : index
    %47 = vector.load %arg9[%c0_25, %c0_26] : memref<1x128xf32, #tpu.memory_space<vmem>>, vector<1x128xf32>
    %cst_27 = arith.constant dense<0.000000e+00> : vector<8xf32>
    %48 = vector.multi_reduction <add>, %45, %cst_27 [1] : vector<8x128xf32> to vector<8xf32>
    %49 = vector.shape_cast %48 : vector<8xf32> to vector<8x1xf32>
    %cst_28 = arith.constant 1.280000e+02 : f32
    %50 = vector.broadcast %cst_28 : f32 to vector<8x1xf32>
    %51 = arith.divf %49, %50 : vector<8x1xf32>
    %52 = arith.mulf %45, %45 : vector<8x128xf32>
    %cst_29 = arith.constant dense<0.000000e+00> : vector<8xf32>
    %53 = vector.multi_reduction <add>, %52, %cst_29 [1] : vector<8x128xf32> to vector<8xf32>
    %54 = vector.shape_cast %53 : vector<8xf32> to vector<8x1xf32>
    %cst_30 = arith.constant 1.280000e+02 : f32
    %55 = vector.broadcast %cst_30 : f32 to vector<8x1xf32>
    %56 = arith.divf %54, %55 : vector<8x1xf32>
    %57 = arith.mulf %51, %51 : vector<8x1xf32>
    %58 = arith.subf %56, %57 : vector<8x1xf32>
    %cst_31 = arith.constant 0.000000e+00 : f32
    %59 = vector.broadcast %cst_31 : f32 to vector<8x1xf32>
    %60 = arith.maximumf %58, %59 : vector<8x1xf32>
    %61 = vector.broadcast %51 : vector<8x1xf32> to vector<8x128xf32>
    %62 = arith.subf %45, %61 : vector<8x128xf32>
    %cst_32 = arith.constant 9.99999993E-9 : f32
    %63 = vector.broadcast %cst_32 : f32 to vector<8x1xf32>
    %64 = arith.addf %60, %63 : vector<8x1xf32>
    %65 = math.rsqrt %64 : vector<8x1xf32>
    %66 = vector.broadcast %65 : vector<8x1xf32> to vector<8x128xf32>
    %67 = arith.mulf %62, %66 : vector<8x128xf32>
    %68 = vector.broadcast %46 : vector<1x128xf32> to vector<8x128xf32>
    %69 = arith.mulf %67, %68 : vector<8x128xf32>
    %70 = vector.broadcast %47 : vector<1x128xf32> to vector<8x128xf32>
    %71 = arith.addf %69, %70 : vector<8x128xf32>
    %cst_33 = arith.constant 5.000000e-01 : f32
    %72 = vector.broadcast %cst_33 : f32 to vector<8x128xf32>
    %73 = arith.mulf %72, %71 : vector<8x128xf32>
    %cst_34 = arith.constant 0.707106769 : f32
    %74 = vector.broadcast %cst_34 : f32 to vector<8x128xf32>
    %75 = arith.mulf %71, %74 : vector<8x128xf32>
    %76 = math.erf %75 : vector<8x128xf32>
    %cst_35 = arith.constant 1.000000e+00 : f32
    %77 = vector.broadcast %cst_35 : f32 to vector<8x128xf32>
    %78 = arith.addf %77, %76 : vector<8x128xf32>
    %79 = arith.mulf %73, %78 : vector<8x128xf32>
    %c0_36 = arith.constant 0 : index
    %c0_37 = arith.constant 0 : index
    %80 = vector.load %arg10[%c0_36, %c0_37] : memref<8x128xf32, #tpu.memory_space<vmem>>, vector<8x128xf32>
    tpu.vector_store %arg10[%c0_36, %c0_37], %79 {strides = array<i32>} : memref<8x128xf32, #tpu.memory_space<vmem>>, vector<8x128xf32>,
    return
  }
  func.func @transform_0(%arg0: i32) -> (i32, i32) {
    %c0_i32 = arith.constant 0 : i32
    %c0_i32_0 = arith.constant 0 : i32
    return %arg0, %c0_i32 : i32, i32
  }
  func.func @transform_1(%arg0: i32) -> (i32, i32) {
    %c0_i32 = arith.constant 0 : i32
    %c0_i32_0 = arith.constant 0 : i32
    %c0_i32_1 = arith.constant 0 : i32
    return %c0_i32, %c0_i32_0 : i32, i32
  }
  func.func @transform_2(%arg0: i32) -> (i32, i32) {
    %c0_i32 = arith.constant 0 : i32
    %c0_i32_0 = arith.constant 0 : i32
    %c0_i32_1 = arith.constant 0 : i32
    return %c0_i32, %c0_i32_0 : i32, i32
  }
  func.func @transform_3(%arg0: i32) -> (i32, i32) {
    %c0_i32 = arith.constant 0 : i32
    %c0_i32_0 = arith.constant 0 : i32
    %c0_i32_1 = arith.constant 0 : i32
    return %c0_i32, %c0_i32_0 : i32, i32
  }
  func.func @transform_4(%arg0: i32) -> (i32, i32) {
    %c0_i32 = arith.constant 0 : i32
    %c0_i32_0 = arith.constant 0 : i32
    %c0_i32_1 = arith.constant 0 : i32
    return %c0_i32, %c0_i32_0 : i32, i32
  }
  func.func @transform_5(%arg0: i32) -> (i32, i32) {
    %c0_i32 = arith.constant 0 : i32
    %c0_i32_0 = arith.constant 0 : i32
    %c0_i32_1 = arith.constant 0 : i32
    return %c0_i32, %c0_i32_0 : i32, i32
  }
  func.func @transform_6(%arg0: i32) -> (i32, i32) {
    %c0_i32 = arith.constant 0 : i32
    %c0_i32_0 = arith.constant 0 : i32
    %c0_i32_1 = arith.constant 0 : i32
    return %c0_i32, %c0_i32_0 : i32, i32
  }
  func.func @transform_7(%arg0: i32) -> (i32, i32) {
    %c0_i32 = arith.constant 0 : i32
    %c0_i32_0 = arith.constant 0 : i32
    %c0_i32_1 = arith.constant 0 : i32
    return %c0_i32, %c0_i32_0 : i32, i32
  }
  func.func @transform_8(%arg0: i32) -> (i32, i32) {
    %c0_i32 = arith.constant 0 : i32
    %c0_i32_0 = arith.constant 0 : i32
    %c0_i32_1 = arith.constant 0 : i32
    return %c0_i32, %c0_i32_0 : i32, i32
  }
  func.func @transform_9(%arg0: i32) -> (i32, i32) {
    %c0_i32 = arith.constant 0 : i32
    %c0_i32_0 = arith.constant 0 : i32
    return %arg0, %c0_i32 : i32, i32
  }
}

</mosaic_0001>

<bundles_post_ra>
// kernel: tpu_custom_call.1
= control target key start
LH: loop header
LB: loop body
LE: loop exit
PB: predicated region body
PF: predicated region fallthrough
CT: control target
= control target key end

     0   :  { %s1362_s0 = inlined_call_operand.hbm [shape: f32[16,128], index: 0, kind: input, shape index: {}]   ;;  %s1363_s1 = inlined_call_operand.hbm [shape: f32[128,256], index: 1, kind: input, shape index: {}]   ;;  %s1364_s2 = inlined_call_operand.vmem [shape: f32[1,256], index: 2, kind: input, shape index: {}]   ;;  %s1365_s3 = inlined_call_operand.vmem [shape: f32[1,256], index: 3, kind: input, shape index: {}]   ;;  %s1366_s4 = inlined_call_operand.vmem [shape: f32[1,256], index: 4, kind: input, shape index: {}]   ;;  %s1367_s5 = inlined_call_operand.hbm [shape: f32[256,128], index: 5, kind: input, shape index: {}]   ;;  %s1368_s6 = inlined_call_operand.vmem [shape: f32[1,128], index: 6, kind: input, shape index: {}]   ;;  %s1369_s7 = inlined_call_operand.vmem [shape: f32[1,128], index: 7, kind: input, shape index: {}]   ;;  %s1370_s8 = inlined_call_operand.vmem [shape: f32[1,128], index: 8, kind: input, shape index: {}]   ;;  %s1371_s9 = inlined_call_operand.hbm [shape: f32[16,128], index: 9, kind: output, shape index: {}]  }
   0x1   :  { %1377 = sst [smem:[#allocation14_spill]] %s1363_s1 }
   0x2   :  { %1378 = sst [smem:[#allocation15_spill]] %s1367_s5 }
   0x3   :  { %14 = vsyncpa [#allocation3], 0 }
   0x4   :  { %16 = vsyncpa [#allocation3 + $0x1], 0 }
   0x5   :  { %17 = vsyncpa [#allocation6], 0 }
   0x6   :  { %18 = vsyncpa [#allocation4], 0 }
   0x7   :  { %20 = vsyncpa [#allocation4 + $0x1], 0  ;;  %s1146_s30 = smov 0   ;;  %s1148_s10 = smov 0  }
   0x8   :  { %s1150_s11 = smov 0   ;;  %s1152_s12 = smov 0  }
   0x9 LB: > { %1379 = sst [smem:[#allocation12_spill]] %s1081_s11  ;;  %s1167_s13 = sadd.s32 4294967295, %s1085_s12   ;;  %s1085_s12 = sphi %s1152_s12, %s1401_s12   ;;  %s1081_s11 = sphi %s1150_s11, %s1398_s11   ;;  %s1077_s10 = sphi %s1148_s10, %s1400_s10   ;;  %s1073_s30 = sphi %s1146_s30, %s1399_s30  }
   0xa   : > { %s801_s14 = sadd.s32 4294967294, %s1085_s12   ;;  %p46_p0 = scmp.ne.s32.totalorder %s1077_s10, %s1073_s30 }
   0xb   : > { %p1372_p1 = scmp.eq.s32.totalorder %s1167_s13, 0  ;;  %p244_p3 = scmp.eq.s32.totalorder %s801_s14, 1 }
   0xc   : > { %p802_p5 = scmp.ge.s32.totalorder %s1085_s12, 1  ;;  %p251_p7 = scmp.lt.s32.totalorder %s1085_s12, 3 }
   0xd   : > { %p1176_p4 = por %p1372_p1, %p46_p0  ;;  %p1181_p6 = por %p244_p3, %p46_p0 }
   0xe   : > { %p1186_p8 = pnand %p802_p5, %p251_p7  ;;  %s1087_s18 = smov [#allocation5]  }
   0xf   : > { %s1380_s15 = scalar_select %p1176_p4, 1, 0 }
  0x10   : > { %s1381_s16 = scalar_select %p1181_p6, 1, 0 }
  0x11   : > { %s1382_s17 = scalar_select %p1186_p8, 1, 0 }
  0x12   : > { %s263_s19 = sshll.u32 %s1087_s18, 4  ;;  %p867_p9 = pneg %p1186_p8  ;;  %s264_s19 = int_to_ptr.vmem [resolvable:$true] %s263_s19 }
  0x13   : > { %s1088_s21 = smov [#allocation7]   ;;  %s948_s23 = scalar_lea.vmem %s264_s19, 4096 }
  0x14   : > { %p1195_p11 = pnand %p867_p9, %p1372_p1  ;;  %s285_s22 = sshll.u32 %s1088_s21, 4  ;;  %s286_s22 = int_to_ptr.vmem [resolvable:$true] %s285_s22 }
  0x15   : > { %p949_p13 = scmp.ne.s32.totalorder %s264_s19, %s948_s23  ;;  %p956_p5 = scmp.lt.s32.totalorder %s264_s19, %s264_s19 }
  0x16   : > { %p939_p12 = pneg %p1195_p11  ;;  %p957_p7 = scmp.lt.s32.totalorder %s948_s23, %s948_s23 }
  0x18   : > { %p951_p0 = pnand %p949_p13, %p939_p12  ;;  %p958_p10 = por %p957_p7, %p956_p5 }
  0x1a   : > { %p952_p3 = pneg %p951_p0 }
  0x1c   : > { %p959_p9 = pnand %p958_p10, %p952_p3 }
  0x1e   : > { %962 = shalt.err (!%p959_p9)
}
  0x1f   : > { %s1089_s24 = smov 256   ;;  %s1090_s25 = smov 16  }
  0x20   : > { %s1384_s1 = sld [smem:[#allocation14_spill]]  ;;  %s974_s28 = scalar_lea.vmem %s286_s22, 4096 }
  0x21   : > { %p975_p1 = scmp.ne.s32.totalorder %s286_s22, %s974_s28  ;;  %p982_p2 = scmp.lt.s32.totalorder %s286_s22, %s286_s22 }
  0x22   : > { %p983_p6 = scmp.lt.s32.totalorder %s974_s28, %s974_s28 }
  0x23   : > { %p977_p13 = pnand %p975_p1, %p939_p12 }
  0x24   : > { %p984_p5 = por %p983_p6, %p982_p2 }
  0x25   : > { %p978_p0 = pneg %p977_p13 }
  0x26   : > { %870 = dma.hbm_to_vmem [thread:$0]  (!%p1195_p11), %s1384_s1, 4096, %s264_s19, [#allocation6], %s1089_s24, %s1089_s24, %s1090_s25  }
  0x27   : > { %p985_p10 = pnand %p984_p5, %p978_p0 }
  0x29   : > { %988 = shalt.err (!%p985_p10)
}
  0x2a   : > { %s1091_s29 = smov 128   ;;  %s1092_s14 = smov 8  }
  0x2b   : > { %s1385_s5 = sld [smem:[#allocation15_spill]]  ;;  %s1218_s21 = sadd.s32 1, %s1085_s12  }
  0x2c   : > { %s30_s23 = ssub.s32 %s1085_s12, %s1218_s21  ;;  %s33_s24 = sadd.s32 1, %s1081_s11 }
  0x2d   : > { %p31_p1 = scmp.eq.s32.totalorder %s30_s23, 0  ;;  %p40_p2 = scmp.ne.s32.totalorder %s1081_s11, %s1077_s10 }
  0x2e   : > { %p41_p6 = scmp.eq.s32.totalorder %s1085_s12, 0  ;;  %p1387_p3 = scmp.eq.s32.totalorder %s1167_s13, 1 }
  0x2f   : > { %s1227_s25 = scalar_select %p31_p1, %s1081_s11, %s33_s24  }
  0x30   : > { %p42_p12 = por %p41_p6, %p40_p2  ;;  %p1231_p7 = por %p1387_p3, %p40_p2 }
  0x31   : > { %873 = dma.hbm_to_vmem [thread:$0]  (!%p1195_p11), %s1385_s5, 4096, %s286_s22, [#allocation6], %s1091_s29, %s1091_s29, %s1092_s14  }
  0x32   : > { %1386 = sst [smem:[#allocation13_spill]] %s1227_s25  ;;  %p884_p9 = scmp.lt.s32.totalorder %s1085_s12, 2 }
  0x33   : > { %s1388_s26 = scalar_select %p1231_p7, 1, 0 }
  0x34   : > { %s308_s20 = sand.u32 1, %s1081_s11   ;;  %s807_s22 = sshll.u32 %s1085_s12, 7 }
  0x35   : > { %s806_s27 = sshll.u32 %s308_s20, 3  ;;  %s1241_s14 = scalar_lea.hbm %s1362_s0, %s807_s22 }
  0x36   : > { %s312_s18 = scalar_lea.vmem [#allocation2], %s806_s27  ;;  %p1243_p11 = pnand %p884_p9, %p42_p12 }
  0x37   : > { %s319_s19 = sshll.u32 %s312_s18, 4  ;;  %s309_s24 = scalar_lea.sflag [#allocation3], %s308_s20  ;;  %s320_s19 = int_to_ptr.vmem [resolvable:$true] %s319_s19 }
  0x38   : > { %s989_s1 = scalar_lea.hbm %s1241_s14, 128  ;;  %p991_p0 = pneg %p1243_p11 }
  0x39   : > { %p990_p13 = scmp.ne.s32.totalorder %s1241_s14, %s989_s1  ;;  %s994_s29 = scalar_lea.hbm %s1362_s0, 256 }
  0x3a   : > { %p995_p1 = scmp.lt.s32.totalorder %s1241_s14, %s1362_s0  ;;  %p996_p2 = scmp.lt.s32.totalorder %s994_s29, %s989_s1 }
  0x3b   : > { %p992_p5 = pnand %p991_p0, %p990_p13 }
  0x3c   : > { %p997_p6 = por %p996_p2, %p995_p1 }
  0x3d   : > { %p993_p10 = pneg %p992_p5 }
  0x3f   : > { %p998_p12 = pnand %p997_p6, %p993_p10 }
  0x41   : > { %1001 = shalt.err (!%p998_p12)
}
  0x42   : > { %s1002_s18 = scalar_lea.vmem %s320_s19, 128  ;;  %s1093_s20 = smov [#allocation2]  }
  0x43   : > { %p1003_p3 = scmp.ne.s32.totalorder %s320_s19, %s1002_s18  ;;  %s1007_s25 = sshll.u32 %s1093_s20, 4  ;;  %s1008_s25 = int_to_ptr.vmem [resolvable:$false] %s1007_s25 }
  0x44   : > { %s1009_s11 = scalar_lea.vmem %s1008_s25, 256  ;;  %p1010_p13 = scmp.lt.s32.totalorder %s320_s19, %s1008_s25 }
  0x45   : > { %p1005_p9 = pnand %p1003_p3, %p991_p0  ;;  %p1011_p5 = scmp.lt.s32.totalorder %s1009_s11, %s1002_s18 }
  0x47   : > { %p1006_p7 = pneg %p1005_p9  ;;  %p1012_p4 = por %p1011_p5, %p1010_p13 }
  0x49   : > { %p1013_p8 = pnand %p1012_p4, %p1006_p7 }
  0x4b   : > { %1016 = shalt.err (!%p1013_p8)
}
  0x4c   : > { %877 = dma.hbm_to_vmem [thread:$0]  (!%p1243_p11), %s1241_s14, 128, %s320_s19, %s309_s24  }
  0x4d   : > { %p1390_p10 = scmp.ne.s32.totalorder %s1382_s17, 0 }
  0x4e   : > { %s1264_s1 = sand.u32 (!%p1390_p10), 1, %s1077_s10   ;;  %p1391_p4 = scmp.ne.s32.totalorder (!%p1390_p10), %s1380_s15, 0 }
  0x4f   : > { %328 = sbr.rel (%p1390_p10) target bundleno = 915 (0x393), region = 56  ;;  %s809_s5 = sshll.u32 (!%p1390_p10), %s1264_s1, 3 }
  0x50   : > { %s331_s25 = scalar_lea.sflag (!%p1390_p10), [#allocation3], %s1264_s1  ;;  %s1270_s11 = scalar_lea.vmem (!%p1390_p10), [#allocation2], %s809_s5 }
  0x54   : > { %1060 = dma.done.wait (%p1391_p4), %s331_s25, 128  }
  0x55   : > { %1062 = vsyncadd (%p1391_p4), %s331_s25, 4294967168  ;;  %p1392_p8 = scmp.eq.s32.totalorder %s1167_s13, 0 }
  0x57   : > { %1064 = dma.done.wait (%p1392_p8), [#allocation6], 8192   ;;  %p1393_p7 = pmov %p1392_p8 }
  0x58   : > { %v1094_v0 = vmov 0.0   ;;  %v409_v1 = vld [vmem:[#allocation5 + $0xf8] sm:$0xff]  ;;  %v408_v2 = vld [vmem:[#allocation5 + $0xf0] sm:$0xff]  ;;  %v407_v3 = vld [vmem:[#allocation5 + $0xe8] sm:$0xff]  ;;  %v412_v34 = vlaneseq  ;;  %s817_s25 = sshll.u32 %s1167_s13, 7  ;;  %s699_s23 = scalar_lea.sflag [#allocation4], %s1264_s1 }
  0x59   : > { %1066 = vsyncadd (%p1393_p7), [#allocation6], 4294959104  ;;  %486 = vmatprep.mubr.f32.mxu0 %v1094_v0  ;;  %422 = vmatprep.subr.mxu0 %v409_v1  ;;  %v406_v4 = vld [vmem:[#allocation5 + $0xe0] sm:$0xff]  ;;  %v405_v5 = vld [vmem:[#allocation5 + $0xd8] sm:$0xff]  ;;  %s710_s19 = scalar_lea.hbm %s1371_s9, %s817_s25  ;;  %p1394_p0 = scmp.ne.s32.totalorder %s1388_s26, 0 }
  0x5a   : > { %423 = vmatpush1.msra.mxu0 %v408_v2  ;;  %v404_v6 = vld [vmem:[#allocation5 + $0xd0] sm:$0xff]  ;;  %v403_v7 = vld [vmem:[#allocation5 + $0xc8] sm:$0xff]  ;;  %v402_v8 = vld [vmem:[#allocation5 + $0xc0] sm:$0xff]  ;;  %v413_v35 = vshrl.u32 %v412_v34, 7  ;;  %s1095_s22 = smov [#allocation8]  }
  0x5b   : > { %424 = vmatprep.subr.mxu0 %v407_v3  ;;  %v401_v9 = vld [vmem:[#allocation5 + $0xb8] sm:$0xff]  ;;  %v400_v10 = vld [vmem:[#allocation5 + $0xb0] sm:$0xff]  ;;  %v399_v11 = vld [vmem:[#allocation5 + $0xa8] sm:$0xff]  ;;  %s1021_s13 = sshll.u32 %s1095_s22, 4  ;;  %s1022_s13 = int_to_ptr.vmem [resolvable:$false] %s1021_s13 }
  0x5c   : > { %425 = vmatpush1.msra.mxu0 %v406_v4  ;;  %v398_v12 = vld [vmem:[#allocation5 + $0xa0] sm:$0xff]  ;;  %v397_v13 = vld [vmem:[#allocation5 + $0x98] sm:$0xff]  ;;  %v396_v14 = vld [vmem:[#allocation5 + $0x90] sm:$0xff]  ;;  %v1284_v36 = vsub.s32 0, %v413_v35  ;;  %v1286_v37 = vsub.s32 1, %v413_v35 }
  0x5d   : > { %426 = vmatprep.subr.mxu0 %v405_v5  ;;  %v395_v15 = vld [vmem:[#allocation5 + $0x88] sm:$0xff]  ;;  %v394_v16 = vld [vmem:[#allocation5 + $0x80] sm:$0xff]  ;;  %v393_v17 = vld [vmem:[#allocation5 + $0x78] sm:$0xff] }
  0x5e   : > { %427 = vmatpush1.msra.mxu0 %v404_v6  ;;  %v392_v18 = vld [vmem:[#allocation5 + $0x70] sm:$0xff]  ;;  %v391_v19 = vld [vmem:[#allocation5 + $0x68] sm:$0xff]  ;;  %v390_v20 = vld [vmem:[#allocation5 + $0x60] sm:$0xff] }
  0x5f   : > { %428 = vmatprep.subr.mxu0 %v403_v7  ;;  %v389_v21 = vld [vmem:[#allocation5 + $0x58] sm:$0xff]  ;;  %v388_v22 = vld [vmem:[#allocation5 + $0x50] sm:$0xff]  ;;  %v387_v23 = vld [vmem:[#allocation5 + $0x48] sm:$0xff] }
  0x60   : > { %429 = vmatpush1.msra.mxu0 %v402_v8  ;;  %v386_v24 = vld [vmem:[#allocation5 + $0x40] sm:$0xff]  ;;  %v385_v25 = vld [vmem:[#allocation5 + $0x38] sm:$0xff]  ;;  %v384_v26 = vld [vmem:[#allocation5 + $0x30] sm:$0xff] }
  0x61   : > { %430 = vmatprep.subr.mxu0 %v401_v9  ;;  %v383_v27 = vld [vmem:[#allocation5 + $0x28] sm:$0xff]  ;;  %v382_v28 = vld [vmem:[#allocation5 + $0x20] sm:$0xff]  ;;  %v381_v29 = vld [vmem:[#allocation5 + $0x18] sm:$0xff] }
  0x62   : > { %431 = vmatpush1.msra.mxu0 %v400_v10  ;;  %v380_v30 = vld [vmem:[#allocation5 + $0x10] sm:$0xff]  ;;  %v379_v31 = vld [vmem:[#allocation5 + $0x8] sm:$0xff]  ;;  %v378_v32 = vld [vmem:[#allocation5] sm:$0xff] }
  0x63   : > { %432 = vmatprep.subr.mxu0 %v399_v11  ;;  %v1281_v33 = vld [vmem:[%s1270_s11] sm:$0xff]  ;;  %v580_v53 = vld [vmem:[#allocation7 + $0xe8] sm:$0xff]  ;;  %v579_v55 = vld [vmem:[#allocation7 + $0xe0] sm:$0xff]  ;;  %s376_s11 = scalar_lea.vmem [#allocation8], %s809_s5  ;;  %s1023_s5 = scalar_lea.vmem %s1022_s13, 256 }
  0x64   : > { %433 = vmatpush1.msra.mxu0 %v398_v12  ;;  %v410_v38 = vld [vmem:[%s1364_s2] sm:$0x3]  ;;  %v582_v49 = vld [vmem:[#allocation7 + $0xf8] sm:$0xff]  ;;  %v564_v54 = vld [vmem:[#allocation7 + $0x68] sm:$0xff]  ;;  %s712_s15 = sshll.u32 %s376_s11, 4  ;;  %s713_s15 = int_to_ptr.vmem [resolvable:$true] %s712_s15 }
  0x65   : > { %434 = vmatprep.subr.mxu0 %v397_v13  ;;  %v415_v39 = vrot.slane %v410_v38, %v1284_v36  ;;  %v419_v40 = vrot.slane %v410_v38, %v1286_v37  ;;  %v566_v50 = vld [vmem:[#allocation7 + $0x78] sm:$0xff]  ;;  %v581_v51 = vld [vmem:[#allocation7 + $0xf0] sm:$0xff]  ;;  %820 = vmatprep.subr.mxu1 %v582_v49  ;;  %v563_v56 = vld [vmem:[#allocation7 + $0x60] sm:$0xff]  ;;  %s1017_s24 = scalar_lea.vmem %s713_s15, 128  ;;  %p1024_p6 = scmp.lt.s32.totalorder %s713_s15, %s1022_s13 }
  0x66   : > { %435 = vmatpush1.msra.mxu0 %v396_v14  ;;  %v565_v52 = vld [vmem:[#allocation7 + $0x70] sm:$0xff]  ;;  %821 = vmatpush3.msra.mxu1 %v566_v50  ;;  %v578_v57 = vld [vmem:[#allocation7 + $0xd8] sm:$0xff]  ;;  %v576_v61 = vld [vmem:[#allocation7 + $0xc8] sm:$0xff]  ;;  %p1018_p11 = scmp.ne.s32.totalorder %s713_s15, %s1017_s24  ;;  %p1025_p12 = scmp.lt.s32.totalorder %s1023_s5, %s1017_s24 }
  0x67   : > { %436 = vmatprep.subr.mxu0 %v395_v15  ;;  %822 = vmatprep.subr.mxu1 %v581_v51  ;;  %v562_v58 = vld [vmem:[#allocation7 + $0x58] sm:$0xff]  ;;  %v577_v59 = vld [vmem:[#allocation7 + $0xd0] sm:$0xff]  ;;  %v560_v62 = vld [vmem:[#allocation7 + $0x48] sm:$0xff] }
  0x68   : > { %437 = vmatpush1.msra.mxu0 %v394_v16  ;;  %823 = vmatpush3.msra.mxu1 %v565_v52  ;;  %v561_v60 = vld [vmem:[#allocation7 + $0x50] sm:$0xff]  ;;  %v575_v63 = vld [vmem:[#allocation7 + $0xc0] sm:$0xff]  ;;  %v574_v1 = vld [vmem:[#allocation7 + $0xb8] sm:$0xff]  ;;  %p1019_p1 = pnand %p1018_p11, %p1394_p0  ;;  %p1026_p3 = por %p1025_p12, %p1024_p6 }
  0x69   : > { %438 = vmatprep.subr.mxu0 %v393_v17  ;;  %824 = vmatprep.subr.mxu1 %v580_v53  ;;  %v559_v0 = vld [vmem:[#allocation7 + $0x40] sm:$0xff]  ;;  %v558_v2 = vld [vmem:[#allocation7 + $0x38] sm:$0xff]  ;;  %v573_v3 = vld [vmem:[#allocation7 + $0xb0] sm:$0xff] }
  0x6a   : > { %439 = vmatpush1.msra.mxu0 %v392_v18  ;;  %825 = vmatpush3.msra.mxu1 %v564_v54  ;;  %v557_v4 = vld [vmem:[#allocation7 + $0x30] sm:$0xff]  ;;  %v572_v5 = vld [vmem:[#allocation7 + $0xa8] sm:$0xff]  ;;  %v571_v7 = vld [vmem:[#allocation7 + $0xa0] sm:$0xff]  ;;  %p1020_p2 = pneg %p1019_p1 }
  0x6b   : > { %440 = vmatprep.subr.mxu0 %v391_v19  ;;  %826 = vmatprep.subr.mxu1 %v579_v55  ;;  %v556_v6 = vld [vmem:[#allocation7 + $0x28] sm:$0xff]  ;;  %v555_v8 = vld [vmem:[#allocation7 + $0x20] sm:$0xff]  ;;  %v570_v9 = vld [vmem:[#allocation7 + $0x98] sm:$0xff] }
  0x6c   : > { %441 = vmatpush1.msra.mxu0 %v390_v20  ;;  %827 = vmatpush3.msra.mxu1 %v563_v56  ;;  %v554_v10 = vld [vmem:[#allocation7 + $0x18] sm:$0xff]  ;;  %v569_v11 = vld [vmem:[#allocation7 + $0x90] sm:$0xff]  ;;  %v568_v13 = vld [vmem:[#allocation7 + $0x88] sm:$0xff]  ;;  %p1027_p9 = pnand %p1026_p3, %p1020_p2 }
  0x6d   : > { %442 = vmatprep.subr.mxu0 %v389_v21  ;;  %828 = vmatprep.subr.mxu1 %v578_v57  ;;  %v553_v12 = vld [vmem:[#allocation7 + $0x10] sm:$0xff]  ;;  %v552_v14 = vld [vmem:[#allocation7 + $0x8] sm:$0xff]  ;;  %v567_v15 = vld [vmem:[#allocation7 + $0x80] sm:$0xff] }
  0x6e   : > { %443 = vmatpush1.msra.mxu0 %v388_v22  ;;  %829 = vmatpush3.msra.mxu1 %v562_v58  ;;  %v551_v16 = vld [vmem:[#allocation7] sm:$0xff] }
  0x6f   : > { %444 = vmatprep.subr.mxu0 %v387_v23  ;;  %830 = vmatprep.subr.mxu1 %v577_v59 }
  0x70   : > { %445 = vmatpush1.msra.mxu0 %v386_v24  ;;  %831 = vmatpush3.msra.mxu1 %v561_v60 }
  0x71   : > { %446 = vmatprep.subr.mxu0 %v385_v25  ;;  %832 = vmatprep.subr.mxu1 %v576_v61  ;;  %v493_v25 = vld [vmem:[%s1365_s3] sm:$0x3] }
  0x72   : > { %447 = vmatpush1.msra.mxu0 %v384_v26  ;;  %833 = vmatpush3.msra.mxu1 %v560_v62  ;;  %v494_v26 = vld [vmem:[%s1366_s4] sm:$0x3] }
  0x73   : > { %448 = vmatprep.subr.mxu0 %v383_v27  ;;  %834 = vmatprep.subr.mxu1 %v575_v63  ;;  %v532_v34 = vrot.slane %v494_v26, %v1284_v36  ;;  %v536_v35 = vrot.slane %v494_v26, %v1286_v37 }
  0x74   : > { %449 = vmatpush1.msra.mxu0 %v382_v28  ;;  %835 = vmatpush3.msra.mxu1 %v559_v0 }
  0x75   : > { %450 = vmatprep.subr.mxu0 %v381_v29  ;;  %836 = vmatprep.subr.mxu1 %v574_v1  ;;  %v519_v29 = vrot.slane %v493_v25, %v1284_v36 }
  0x76   : > { %451 = vmatpush1.msra.mxu0 %v380_v30  ;;  %837 = vmatpush3.msra.mxu1 %v558_v2  ;;  %v523_v30 = vrot.slane %v493_v25, %v1286_v37  ;;  %v813_v37 = vld [vmem:[%s1368_s6] ss:$0 sm:$0xff] }
  0x77   : > { %452 = vmatprep.subr.mxu0 %v379_v31  ;;  %838 = vmatprep.subr.mxu1 %v573_v3 }
  0x78   : > { %453 = vmatpush1.msra.mxu0 %v378_v32  ;;  %839 = vmatpush3.msra.mxu1 %v557_v4 }
  0x79   : > { %487 = vmatmul.mubr.f32.vlgmr.msra.gmra.mxu0 %v1281_v33  ;;  %840 = vmatprep.subr.mxu1 %v572_v5  ;;  %v815_v5 = vld [vmem:[%s1370_s8] ss:$0 sm:$0xff] }
  0x7a   : > { %841 = vmatpush3.msra.mxu1 %v556_v6 }
  0x7b   : > { %842 = vmatprep.subr.mxu1 %v571_v7 }
  0x7c   : > { %843 = vmatpush3.msra.mxu1 %v555_v8 }
  0x7d   : > { %844 = vmatprep.subr.mxu1 %v570_v9 }
  0x7e   : > { %845 = vmatpush3.msra.mxu1 %v554_v10 }
  0x7f   : > { %846 = vmatprep.subr.mxu1 %v569_v11 }
  0x80   : > { %847 = vmatpush3.msra.mxu1 %v553_v12 }
  0x81   : > { %848 = vmatprep.subr.mxu1 %v568_v13 }
  0x82   : > { %849 = vmatpush3.msra.mxu1 %v552_v14 }
  0x83   : > { %850 = vmatprep.subr.mxu1 %v567_v15 }
  0x84   : > { %851 = vmatpush3.msra.mxu1 %v551_v16 }
 0x139   : > { %v488_v41 = vpop.f32.mrf.mxu0 }
 0x13a   : > { %v1293_v43 = vadd.f32 %v488_v41, %v415_v39 }
 0x13b   : > { %v490_v42 = vpop.f32.mrf.mxu0 }
 0x13c   : > { %v1295_v44 = vadd.f32 %v490_v42, %v419_v40  ;;  %v500_v47 = vmul.f32 %v1293_v43, %v1293_v43 }
 0x13e   : > { %v495_v45 = vadd.f32 %v1295_v44, %v1293_v43  ;;  %v501_v46 = vmul.f32 %v1295_v44, %v1295_v44 }
 0x140   : > { %496 = vadd.xlane.f32.xlu0 %v495_v45  ;;  %v502_v48 = vadd.f32 %v501_v46, %v500_v47 }
 0x144   : > { %503 = vadd.xlane.f32.xlu0 %v502_v48 }
 0x1c9   : > { %v497_v17 = vpop.xlane.xlu0 %496 }
 0x1ca   : > { %v499_v18 = vmul.f32 0.00390625, %v497_v17 }
 0x1cc   : > { %v506_v20 = vmul.f32 %v499_v18, %v499_v18  ;;  %v509_v27 = vsub.f32 %v1293_v43, %v499_v18  ;;  %v510_v28 = vsub.f32 %v1295_v44, %v499_v18 }
 0x1cd   : > { %v504_v19 = vpop.xlane.xlu0 %503 }
 0x1ce   : > { %v505_v21 = vmul.f32 0.00390625, %v504_v19 }
 0x1d0   : > { %v507_v22 = vsub.f32 %v505_v21, %v506_v20 }
 0x1d2   : > { %v508_v23 = vmax.f32 %v507_v22, 0.0 }
 0x1d4   : > { %v511_v24 = vadd.f32 1e-08, %v508_v23 }
 0x1d6   : > { %927 = vrsqrt.f32 %v511_v24 }
 0x1e3   : > { %v928_v31 = vpop.eup %927 }
 0x1e4   : > { %v514_v32 = vmul.f32 %v928_v31, %v510_v28  ;;  %v513_v38 = vmul.f32 %v928_v31, %v509_v27 }
 0x1e6   : > { %v527_v39 = vmul.f32 %v523_v30, %v514_v32  ;;  %v526_v40 = vmul.f32 %v519_v29, %v513_v38 }
 0x1e8   : > { %v540_v41 = vadd.f32 %v536_v35, %v527_v39  ;;  %v539_v42 = vadd.f32 %v532_v34, %v526_v40 }
 0x1ea   : > { %v544_v45 = vmul.f32 0.70710677, %v540_v41  ;;  %v543_v46 = vmul.f32 0.70710677, %v539_v42  ;;  %v542_v47 = vmul.f32 0.5, %v540_v41  ;;  %v541_v49 = vmul.f32 0.5, %v539_v42 }
 0x1ec   : > { %929 = verf.f32 %v544_v45 }
 0x1ed   : > { %931 = verf.f32 %v543_v46 }
 0x1f9   : > { %v930_v43 = vpop.eup %929 }
 0x1fa   : > { %v932_v44 = vpop.eup %931  ;;  %v548_v48 = vadd.f32 1.0, %v930_v43 }
 0x1fb   : > { %v547_v50 = vadd.f32 1.0, %v932_v44 }
 0x1fc   : > { %v550_v51 = vmul.f32 %v548_v48, %v542_v47 }
 0x1fd   : > { %v549_v52 = vmul.f32 %v547_v50, %v541_v49 }
 0x1fe   : > { %654 = vmatprep.mubr.f32.mxu1 %v550_v51 }
 0x1ff   : > { %655 = vmatmul.mubr.f32.vlgmr.msra.gmra.mxu1 %v549_v52 }
 0x2bf   : > { %v852_v36 = vpop.f32.mrf.mxu1 }
 0x2c1   : > { %v853_v53 = vpop.f32.mrf.mxu1 }
 0x2c2   : > { %v854_v54 = vadd.f32 %v853_v53, %v852_v36 }
 0x2c4   : > { %v657_v55 = vadd.f32 %v854_v54, %v813_v37 }
 0x2c6   : > { %v660_v56 = vadd.f32 %v657_v55, %v1281_v33  ;;  %v814_v33 = vld [vmem:[%s1369_s7] ss:$0 sm:$0xff] }
 0x2c8   : > { %663 = vadd.xlane.f32.xlu1 %v660_v56  ;;  %v667_v57 = vmul.f32 %v660_v56, %v660_v56 }
 0x2cc   : > { %668 = vadd.xlane.f32.xlu1 %v667_v57 }
 0x351   : > { %v664_v58 = vpop.xlane.xlu1 %663 }
 0x352   : > { %v666_v59 = vmul.f32 0.0078125, %v664_v58 }
 0x354   : > { %v671_v61 = vmul.f32 %v666_v59, %v666_v59  ;;  %v674_v2 = vsub.f32 %v660_v56, %v666_v59 }
 0x355   : > { %v669_v60 = vpop.xlane.xlu1 %668 }
 0x356   : > { %v670_v62 = vmul.f32 0.0078125, %v669_v60 }
 0x358   : > { %v672_v63 = vsub.f32 %v670_v62, %v671_v61 }
 0x35a   : > { %v673_v0 = vmax.f32 %v672_v63, 0.0 }
 0x35c   : > { %v675_v1 = vadd.f32 1e-08, %v673_v0 }
 0x35e   : > { %933 = vrsqrt.f32 %v675_v1 }
 0x36b   : > { %v934_v3 = vpop.eup %933 }
 0x36c   : > { %v677_v4 = vmul.f32 %v934_v3, %v674_v2 }
 0x36e   : > { %v684_v6 = vmul.f32 %v814_v33, %v677_v4 }
 0x370   : > { %v691_v7 = vadd.f32 %v815_v5, %v684_v6 }
 0x372   : > { %v693_v8 = vmul.f32 0.70710677, %v691_v7  ;;  %v692_v10 = vmul.f32 0.5, %v691_v7 }
 0x374   : > { %935 = verf.f32 %v693_v8 }
 0x381   : > { %v936_v9 = vpop.eup %935 }
 0x382   : > { %v695_v11 = vadd.f32 1.0, %v936_v9 }
 0x384   : > { %v696_v12 = vmul.f32 %v695_v11, %v692_v10 }
 0x386   : > { %697 = vst [vmem:[%s376_s11] sm:$0xff] %v696_v12 }
 0x387   : > { %1030 = shalt.err (!%p1027_p9)
}
 0x388   : > { %s1031_s28 = scalar_lea.hbm %s710_s19, 128  ;;  %s1035_s27 = scalar_lea.hbm %s1371_s9, 256 }
 0x389   : > { %p1032_p13 = scmp.ne.s32.totalorder %s710_s19, %s1031_s28  ;;  %p1036_p4 = scmp.lt.s32.totalorder %s710_s19, %s1371_s9 }
 0x38a   : > { %p1037_p8 = scmp.lt.s32.totalorder %s1035_s27, %s1031_s28 }
 0x38b   : > { %p1033_p5 = pnand %p1032_p13, %p1394_p0 }
 0x38c   : > { %p1038_p7 = por %p1037_p8, %p1036_p4 }
 0x38d   : > { %p1034_p10 = pneg %p1033_p5 }
 0x38f   : > { %p1039_p11 = pnand %p1038_p7, %p1034_p10 }
 0x391   : > { %1042 = shalt.err (!%p1039_p11)
}
 0x392   : > { %865 = dma.vmem_to_hbm [thread:$0]  (%p1394_p0), %s713_s15, 128, %s710_s19, %s699_s23  }
 0x393 PF: > { %s724_s25 = sand.u32 1, %s1073_s30   ;;  %p1395_p1 = scmp.ne.s32.totalorder %s1381_s16, 0 }
 0x394   : > { %p1396_p2 = scmp.ge.s32.totalorder %s1085_s12, 2  ;;  %s725_s11 = scalar_lea.sflag [#allocation4], %s724_s25 }
 0x396   : > { %p879_p6 = pnand %p1396_p2, %p1395_p1 }
 0x398   : > { %p880_p12 = pneg %p879_p6 }
 0x39a   : > { %1068 = dma.done.wait (%p880_p12), %s725_s11, 128  }
 0x39b   : > { %1070 = vsyncadd (%p880_p12), %s725_s11, 4294967168  ;;  %s1397_s17 = sld [smem:[#allocation12_spill]]  ;;  %p23_p3 = scmp.ge.s32.totalorder %s1218_s21, 4  }
 0x39c   : > { %s1398_s11 = sld [smem:[#allocation13_spill]]  ;;  %s1399_s30 = smov %s1077_s10 }
 0x39d   : > { %s1401_s12 = smov %s1218_s21  ;;  %25 = sbr.rel (!%p23_p3) target bundleno = 9 (0x9), region = 109 }
 0x3a1   : > { %s1400_s10 = smov %s1397_s17 }
 0x3a2   :  { %730 = vsyncpa [#allocation3], 1 }
 0x3a3   :  { %732 = vsyncpa [#allocation3 + $0x1], 1 }
 0x3a4   :  { %733 = vsyncpa [#allocation6], 1 }
 0x3a5   :  { %734 = vsyncpa [#allocation4], 1 }
 0x3a6   :  { %736 = vsyncpa [#allocation4 + $0x1], 1 }

</bundles_post_ra>
